<compile_context>
chip_gen: v6e
topology: v6e:2x2x1
jax: 0.10.0
libtpu: 0.0.40
codegen_flags: <defaults>
</compile_context>

<pallas_src>
import jax
import jax.numpy as jnp
from jax.experimental import pallas as pl
from jax.experimental.pallas import tpu as pltpu

NO_DIV_BY_ZERO = 1e-9

_MAX_LANE_TILE = 2048            # lane (last-dim) tile upper bound, mult of 128
_MIN_TOTAL_STEPS = 8             # target grid steps for pipelining
_MIN_BYTES_FOR_SPLIT = 1 << 20   # don't bother splitting sub-MiB arrays


def _cdiv(a, b):
    return -(-a // b)


def _sublane_align(itemsize):
    # 8 for f32, 16 for bf16/f16, 32 for 8-bit types.
    return {4: 8, 2: 16, 1: 32}.get(int(itemsize), 8)


def _pick_lane_tile(lanes):
    """Full extent if small; otherwise the largest 128-multiple divisor."""
    if lanes <= _MAX_LANE_TILE:
        return lanes
    for cand in range(_MAX_LANE_TILE, 127, -128):
        if lanes % cand == 0:
            return cand
    return _MAX_LANE_TILE   # fallback: last column of blocks is partial


def _choose_tiles(rows, lanes, itemsize, target_block_bytes):
    """Pick (row_tile, lane_tile): layout-legal, VMEM-friendly, enough steps."""
    sub = _sublane_align(itemsize)
    t_tile = _pick_lane_tile(lanes)

    budget_rows = max(sub, (target_block_bytes // max(t_tile * itemsize, 1)) // sub * sub)
    r_tile = rows if rows <= budget_rows else budget_rows

    total_bytes = rows * lanes * itemsize
    if total_bytes >= _MIN_BYTES_FOR_SPLIT:
        # >= 2 steps on the leading (megacore-sharded) axis when rows allow it.
        if _cdiv(rows, r_tile) < 2 and rows > sub:
            r_tile = max(sub, (((rows + 1) // 2) // sub) * sub)
        # >= ~8 total steps so the pipeline can overlap DMA and compute.
        while _cdiv(rows, r_tile) * _cdiv(lanes, t_tile) < _MIN_TOTAL_STEPS:
            if r_tile > sub:
                r_tile = max(sub, ((r_tile // 2) // sub) * sub)
            elif t_tile > 128 and t_tile % 2 == 0 and (t_tile // 2) % 128 == 0:
                t_tile //= 2
            else:
                break
        # Prefer an even number of row steps (v7x megacore load balance).
        nr = _cdiv(rows, r_tile)
        if nr > 1 and nr % 2 == 1:
            cand = max(sub, ((_cdiv(rows, nr + 1) + sub - 1) // sub) * sub)
            if _cdiv(rows, cand) % 2 == 0:
                r_tile = cand

    return r_tile, t_tile


def _vmem_budget():
    """(target_block_bytes, vmem_limit_bytes), generation-aware."""
    vmem = None
    try:
        info = pltpu.get_tpu_info()
        vmem = int(getattr(info, "vmem_capacity_bytes"))
    except Exception:
        vmem = None
    if vmem is not None and vmem >= 96 * 1024 * 1024:
        # 128-MiB-VMEM chips (v5e / v6e): larger blocks amortize per-step cost.
        return 8 * 1024 * 1024, 64 * 1024 * 1024
    # v7x (64 MiB per TC) or unknown: keep blocks modest, limit conservative.
    return 4 * 1024 * 1024, 40 * 1024 * 1024


def _snake_kernel(x_ref, a_ref, inv_ref, o_ref):
    """Elementwise Snake on one (R, L) block.

    a_ref / inv_ref are precomputed per-channel constants shaped (R, 1)
    (channel-on-rows layout) or (1, L) (channel-on-lanes layout); either
    broadcasts cleanly against the (R, L) block.
    """
    x = x_ref[...].astype(jnp.float32)
    s = jnp.sin(x * a_ref[...])
    o_ref[...] = (x + inv_ref[...] * (s * s)).astype(o_ref.dtype)


def snake(x, alpha, *, alpha_logscale=False, donate_x=False):
    """Snake activation.

    x:     (B, C, T) float array
    alpha: (C,) per-channel parameter (matches PyTorch Snake.alpha)
    """
    B, C, T = x.shape
    assert alpha.shape == (C,)

    # Per-channel constants, precomputed once on the host side (C elements).
    a = alpha.astype(jnp.float32)
    if alpha_logscale:
        a = jnp.exp(a)
    inv_a = 1.0 / (a + NO_DIV_BY_ZERO)

    itemsize = jnp.dtype(x.dtype).itemsize
    target_block_bytes, vmem_limit = _vmem_budget()

    small_t = T < 128
    if small_t:
        # Fold C*T onto lanes so a tiny T doesn't leave most lanes dead.
        rows, lanes = B, C * T
        x2 = x.reshape(rows, lanes)
        a2 = jnp.repeat(a, T)[None, :]              # (1, C*T)
        inv2 = jnp.repeat(inv_a, T)[None, :]        # (1, C*T)
    else:
        rows, lanes = B * C, T
        x2 = x.reshape(rows, lanes)
        a2 = jnp.broadcast_to(a[None, :], (B, C)).reshape(rows, 1)
        inv2 = jnp.broadcast_to(inv_a[None, :], (B, C)).reshape(rows, 1)

    r_tile, t_tile = _choose_tiles(rows, lanes, itemsize, target_block_bytes)
    grid = (_cdiv(rows, r_tile), _cdiv(lanes, t_tile))

    if small_t:
        a_spec = pl.BlockSpec((1, t_tile), lambda r, t: (0, t))
    else:
        # Alpha block follows the row-tile index only; resident across t steps.
        a_spec = pl.BlockSpec((r_tile, 1), lambda r, t: (r, 0))

    n = rows * lanes
    cost = pl.CostEstimate(
        flops=5 * n,
        transcendentals=n,
        bytes_accessed=2 * n * itemsize + 2 * a2.size * 4,
    )

    out2 = pl.pallas_call(
        _snake_kernel,
        out_shape=jax.ShapeDtypeStruct((rows, lanes), x.dtype),
        grid=grid,
        in_specs=[
            pl.BlockSpec((r_tile, t_tile), lambda r, t: (r, t)),
            a_spec,
            a_spec,
        ],
        out_specs=pl.BlockSpec((r_tile, t_tile), lambda r, t: (r, t)),
        compiler_params=pltpu.CompilerParams(
            dimension_semantics=("parallel", "parallel"),
            vmem_limit_bytes=vmem_limit,
        ),
        cost_estimate=cost,
        input_output_aliases=({0: 0} if donate_x else {}),
    )(x2, a2, inv2)

    return out2.reshape(B, C, T)


def snake_ref(x, alpha, *, alpha_logscale=False):
    """Pure-JAX reference matching the PyTorch forward."""
    a = alpha.reshape(1, -1, 1).astype(jnp.float32)
    if alpha_logscale:
        a = jnp.exp(a)
    xf = x.astype(jnp.float32)
    out = xf + 1.0 / (a + NO_DIV_BY_ZERO) * jnp.sin(xf * a) ** 2
    return out.astype(x.dtype)


if __name__ == "__main__":
    key = jax.random.PRNGKey(0)

    # Small-T path (T < 128 -> channel-on-lanes layout).
    B, C, T = 2, 4, 16
    x = jax.random.normal(key, (B, C, T), dtype=jnp.float32)

    # alpha_logscale=False -> alpha = ones(in_features) (PyTorch init)
    alpha = jnp.ones((C,), dtype=jnp.float32)
    out = jax.block_until_ready(snake(x, alpha, alpha_logscale=False))
    expected = snake_ref(x, alpha, alpha_logscale=False)
    assert out.shape == (B, C, T)
    assert jnp.allclose(out, expected, atol=1e-5, rtol=1e-5)

    # alpha_logscale=True -> alpha = zeros(in_features) (PyTorch init)
    alpha_log = jnp.zeros((C,), dtype=jnp.float32)
    out_log = jax.block_until_ready(snake(x, alpha_log, alpha_logscale=True))
    expected_log = snake_ref(x, alpha_log, alpha_logscale=True)
    assert jnp.allclose(out_log, expected_log, atol=1e-5, rtol=1e-5)

    # Larger-T path (channel-on-rows layout), non-trivial alpha values.
    key2, key3 = jax.random.split(key)
    B2, C2, T2 = 2, 4, 256
    x2 = jax.random.normal(key2, (B2, C2, T2), dtype=jnp.float32)
    alpha2 = 0.5 + jax.random.uniform(key3, (C2,), dtype=jnp.float32)
    out2 = jax.block_until_ready(snake(x2, alpha2, alpha_logscale=False))
    expected2 = snake_ref(x2, alpha2, alpha_logscale=False)
    assert out2.shape == (B2, C2, T2)
    assert jnp.allclose(out2, expected2, atol=1e-5, rtol=1e-5)

    print("KERNEL_OK")
</pallas_src>

<mosaic_0001>
module attributes {stable_mosaic.version = 11 : i64} {
  func.func @_snake_kernel(%arg0: i32, %arg1: i32, %arg2: memref<2x64xf32, #tpu.memory_space<vmem>>, %arg3: memref<1x64xf32, #tpu.memory_space<vmem>>, %arg4: memref<1x64xf32, #tpu.memory_space<vmem>>, %arg5: memref<2x64xf32, #tpu.memory_space<vmem>>) attributes {dimension_semantics = [#tpu.dimension_semantics<parallel>, #tpu.dimension_semantics<parallel>], iteration_bounds = array<i64: 1, 1>, scalar_prefetch = 0 : i64, scratch_operands = 0 : i64, tpu.core_type = #tpu.core_type<tc>, window_params = [{transform_indices = @transform_0, window_bounds = array<i64: 2, 64>}, {transform_indices = @transform_1, window_bounds = array<i64: 1, 64>}, {transform_indices = @transform_2, window_bounds = array<i64: 1, 64>}, {transform_indices = @transform_3, window_bounds = array<i64: 2, 64>}]} {
    %c0 = arith.constant 0 : index
    %c0_0 = arith.constant 0 : index
    %0 = vector.load %arg2[%c0, %c0_0] : memref<2x64xf32, #tpu.memory_space<vmem>>, vector<2x64xf32>
    %c0_1 = arith.constant 0 : index
    %c0_2 = arith.constant 0 : index
    %1 = vector.load %arg3[%c0_1, %c0_2] : memref<1x64xf32, #tpu.memory_space<vmem>>, vector<1x64xf32>
    %2 = vector.broadcast %1 : vector<1x64xf32> to vector<2x64xf32>
    %3 = arith.mulf %0, %2 : vector<2x64xf32>
    %4 = math.sin %3 : vector<2x64xf32>
    %c0_3 = arith.constant 0 : index
    %c0_4 = arith.constant 0 : index
    %5 = vector.load %arg4[%c0_3, %c0_4] : memref<1x64xf32, #tpu.memory_space<vmem>>, vector<1x64xf32>
    %6 = arith.mulf %4, %4 : vector<2x64xf32>
    %7 = vector.broadcast %5 : vector<1x64xf32> to vector<2x64xf32>
    %8 = arith.mulf %7, %6 : vector<2x64xf32>
    %9 = arith.addf %0, %8 : vector<2x64xf32>
    %c0_5 = arith.constant 0 : index
    %c0_6 = arith.constant 0 : index
    %10 = vector.load %arg5[%c0_5, %c0_6] : memref<2x64xf32, #tpu.memory_space<vmem>>, vector<2x64xf32>
    tpu.vector_store %arg5[%c0_5, %c0_6], %9 {strides = array<i32>} : memref<2x64xf32, #tpu.memory_space<vmem>>, vector<2x64xf32>,
    return
  }
  func.func @transform_0(%arg0: i32, %arg1: i32) -> (i32, i32) {
    %c0_i32 = arith.constant 0 : i32
    return %arg0, %arg1 : i32, i32
  }
  func.func @transform_1(%arg0: i32, %arg1: i32) -> (i32, i32) {
    %c0_i32 = arith.constant 0 : i32
    %c0_i32_0 = arith.constant 0 : i32
    return %c0_i32, %arg1 : i32, i32
  }
  func.func @transform_2(%arg0: i32, %arg1: i32) -> (i32, i32) {
    %c0_i32 = arith.constant 0 : i32
    %c0_i32_0 = arith.constant 0 : i32
    return %c0_i32, %arg1 : i32, i32
  }
  func.func @transform_3(%arg0: i32, %arg1: i32) -> (i32, i32) {
    %c0_i32 = arith.constant 0 : i32
    return %arg0, %arg1 : i32, i32
  }
}

</mosaic_0001>

<bundles_post_ra>
// kernel: tpu_custom_call.1
= control target key start
LH: loop header
LB: loop body
LE: loop exit
PB: predicated region body
PF: predicated region fallthrough
CT: control target
= control target key end

     0   :  { %8 = vsyncpa [#allocation3], 0  ;;  %s298_s0 = inlined_call_operand.hbm [shape: f32[2,64], index: 0, kind: input, shape index: {}]   ;;  %s299_s1 = inlined_call_operand.vmem [shape: f32[1,64], index: 1, kind: input, shape index: {}]   ;;  %s300_s2 = inlined_call_operand.vmem [shape: f32[1,64], index: 2, kind: input, shape index: {}]   ;;  %s301_s3 = inlined_call_operand.hbm [shape: f32[2,64], index: 3, kind: output, shape index: {}]  }
   0x1   :  { %9 = vsyncpa [#allocation4], 0  ;;  %s233_s12 = smov [#allocation2]  }
   0x2   :  { %s16_s13 = sshll.u32 %s233_s12, 4  ;;  %s17_s13 = int_to_ptr.vmem [resolvable:$true] %s16_s13 }
   0x3   :  { %s197_s14 = scalar_lea.vmem %s17_s13, 32  ;;  %p202_p1 = scmp.lt.s32.totalorder %s17_s13, %s17_s13 }
   0x4   :  { %p198_p0 = scmp.ne.s32.totalorder %s17_s13, %s197_s14  ;;  %p203_p2 = scmp.lt.s32.totalorder %s197_s14, %s197_s14 }
   0x6   :  { %p204_p3 = por %p203_p2, %p202_p1 }
   0x8   :  { %p205_p4 = pnand %p204_p3, %p198_p0 }
   0xa   :  { %208 = shalt.err (!%p205_p4)
}
   0xb   :  { %19 = dma.hbm_to_vmem [thread:$0]  %s298_s0, 32, %s17_s13, [#allocation3]  }
   0xc   :  { %229 = dma.done.wait [#allocation3], 32  }
   0xd   :  { %230 = vsyncadd [#allocation3], 4294967264  ;;  %v264_v0 = vld [vmem:[#allocation2] sm:$0x3]  ;;  %v234_v14 = vmov 683565275  }
   0xe   :  { %v167_v1 = vld [vmem:[%s299_s1] ss:$0 sm:$0xff]  ;;  %v235_v16 = vmov 2475754826   ;;  %v236_v18 = vmov 2131351028  }
   0xf   :  { %v270_v2 = vmul.f32 %v167_v1, %v264_v0  ;;  %v237_v20 = vmov 2102212464   ;;  %v238_v22 = vmov 920167782   ;;  %v239_v29 = vmov 1326507024  }
  0x10   :  { %s240_s19 = smov [#allocation5]   ;;  %vm150_vm13 = vcmask 517120  }
  0x11   :  { %v39_v3 = vand.u32 2139095040, %v270_v2  ;;  %v36_v5 = vand.u32 2147483647, %v270_v2  ;;  %vm38_vm7 = vcmp.lt.s32.totalorder %v270_v2, 0  ;;  %vm128_vm12 = vweird.f32 %v270_v2  ;;  %s158_s20 = sshll.u32 %s240_s19, 4  ;;  %s159_s20 = int_to_ptr.vmem [resolvable:$true] %s158_s20 }
  0x12   :  { %s209_s21 = scalar_lea.vmem %s159_s20, 32  ;;  %p214_p6 = scmp.lt.s32.totalorder %s159_s20, %s159_s20 }
  0x13   :  { %v40_v4 = vshrl.u32 %v39_v3, 23  ;;  %v43_v8 = vand.u32 8388607, %v36_v5  ;;  %vm37_vm8 = vcmp.le.f32.partialorder %v36_v5, 0.7853982  ;;  %p210_p5 = scmp.ne.s32.totalorder %s159_s20, %s209_s21  ;;  %p215_p7 = scmp.lt.s32.totalorder %s209_s21, %s209_s21 }
  0x15   :  { %v168_v6 = vadd.s32 4294967169, %v40_v4  ;;  %v44_v11 = vor.u32 8388608, %v43_v8  ;;  %p216_p8 = por %p215_p7, %p214_p6 }
  0x17   :  { %v46_v7 = vadd.s32 1, %v168_v6  ;;  %v84_v31 = vshll.u32 %v44_v11, 8  ;;  %p217_p9 = pnand %p216_p8, %p210_p5 }
  0x19   :  { %vm47_vm0 = vcmp.gt.s32.totalorder %v46_v7, 0 }
  0x1a   :  { %v48_v9 = vsel %vm47_vm0, %v46_v7, 0 }
  0x1b   :  { %v50_v10 = vand.u32 31, %v48_v9  ;;  %v49_v12 = vshrl.u32 %v48_v9, 5 }
  0x1d   :  { %v51_v13 = vsub.s32 32, %v50_v10  ;;  %v53_v15 = vshll.u32 %v234_v14, %v50_v10  ;;  %v56_v17 = vshll.u32 %v235_v16, %v50_v10  ;;  %v59_v19 = vshll.u32 %v236_v18, %v50_v10 }
  0x1e   :  { %v62_v21 = vshll.u32 %v237_v20, %v50_v10  ;;  %v65_v23 = vshll.u32 %v238_v22, %v50_v10  ;;  %vm68_vm1 = vcmp.lt.s32.totalorder %v49_v12, 1  ;;  %vm71_vm2 = vcmp.lt.s32.totalorder %v49_v12, 4 }
  0x1f   :  { %v52_v24 = vshrl.u32 %v234_v14, %v51_v13  ;;  %v54_v25 = vshrl.u32 %v235_v16, %v51_v13  ;;  %v57_v26 = vshrl.u32 %v236_v18, %v51_v13  ;;  %v60_v27 = vshrl.u32 %v237_v20, %v51_v13 }
  0x20   :  { %v63_v28 = vshrl.u32 %v238_v22, %v51_v13  ;;  %v66_v30 = vshrl.u32 %v239_v29, %v51_v13  ;;  %vm69_vm3 = vcmp.lt.s32.totalorder %v49_v12, 2  ;;  %vm70_vm4 = vcmp.lt.s32.totalorder %v49_v12, 3 }
  0x21   :  { %v55_v32 = vor.u32 %v54_v25, %v53_v15  ;;  %v58_v33 = vor.u32 %v57_v26, %v56_v17  ;;  %v61_v34 = vor.u32 %v60_v27, %v59_v19 }
  0x22   :  { %v64_v35 = vor.u32 %v63_v28, %v62_v21  ;;  %v67_v36 = vor.u32 %v66_v30, %v65_v23 }
  0x23   :  { %v72_v37 = vsel %vm68_vm1, %v52_v24, %v55_v32  ;;  %v73_v38 = vsel %vm71_vm2, %v61_v34, 2102212464  ;;  %v76_v39 = vsel %vm68_vm1, %v55_v32, %v58_v33  ;;  %v80_v40 = vsel %vm68_vm1, %v58_v33, %v61_v34  ;;  %v172_v32 = vld [vmem:[%s300_s2] ss:$0 sm:$0xff] }
  0x24   :  { %v74_v41 = vsel %vm70_vm4, %v58_v33, %v73_v38  ;;  %v77_v42 = vsel %vm71_vm2, %v64_v35, 920167782  ;;  %v81_v43 = vsel %vm71_vm2, %v67_v36, 1326507024 }
  0x25   :  { %v78_v44 = vsel %vm70_vm4, %v61_v34, %v77_v42  ;;  %v82_v45 = vsel %vm70_vm4, %v64_v35, %v81_v43  ;;  %v75_v46 = vsel %vm69_vm3, %v72_v37, %v74_v41 }
  0x26   :  { %v79_v47 = vsel %vm69_vm3, %v76_v39, %v78_v44  ;;  %v83_v48 = vsel %vm69_vm3, %v80_v40, %v82_v45  ;;  %v91_v53 = vmul.u32 %v84_v31, %v75_v46 }
  0x27   :  { %v276_v49 = vmul.u32.u64.low %v84_v31, %v83_v48  ;;  %v277_v50 = vmul.u32.u64.high %v84_v31, %v83_v48, %v276_v49  ;;  %v279_v51 = vmul.u32.u64.low %v84_v31, %v79_v47  ;;  %v280_v52 = vmul.u32.u64.high %v84_v31, %v79_v47, %v279_v51 }
  0x29   :  { %vm93_vm5 = vc.u32 %v277_v50, %v279_v51  ;;  %v94_v54 = vadd.s32 1, %v280_v52  ;;  %v92_v3 = vadd.s32 %v279_v51, %v277_v50 }
  0x2b   :  { %v95_v55 = vsel %vm93_vm5, %v94_v54, %v280_v52 }
  0x2c   :  { %v96_v56 = vadd.s32 %v95_v55, %v91_v53 }
  0x2e   :  { %v97_v57 = vadd.s32 536870912, %v96_v56 }
  0x30   :  { %v98_v58 = vshrl.u32 %v97_v57, 30 }
  0x32   :  { %v99_v59 = vshll.u32 %v98_v58, 30  ;;  %v122_v17 = vsub.s32 4, %v98_v58 }
  0x34   :  { %v100_v60 = vsub.s32 %v96_v56, %v99_v59  ;;  %v123_v20 = vsel %vm38_vm7, %v122_v17, %v98_v58 }
  0x35   :  { %v125_v22 = vsel %vm37_vm8, 0, %v123_v20 }
  0x36   :  { %v102_v61 = vsub.s32 0, %v100_v60  ;;  %v129_v23 = vadd.s32 3, %v125_v22 }
  0x38   :  { %v169_v62 = vmin.u32 %v102_v61, %v100_v60  ;;  %v130_v24 = vand.u32 3, %v129_v23 }
  0x3a   :  { %v104_v63 = vclz %v169_v62  ;;  %vm135_vm9 = vcmp.eq.s32.totalorder %v130_v24, 2  ;;  %vm132_vm10 = vcmp.eq.s32.totalorder %v130_v24, 0  ;;  %vm131_vm11 = vcmp.lt.s32.totalorder %v130_v24, 2 }
  0x3c   :  { %v170_v1 = vadd.s32 4294967294, %v104_v63 }
  0x3e   :  { %vm171_vm6 = vcmp.lt.s32.totalorder %v170_v1, 0 }
  0x3f   :  { %v107_v4 = vsel %vm171_vm6, 0, %v170_v1 }
  0x40   :  { %v108_v6 = vsub.s32 32, %v107_v4  ;;  %v109_v7 = vshll.u32 %v100_v60, %v107_v4  ;;  %v112_v8 = vsub.s32 4294967266, %v107_v4 }
  0x42   :  { %v110_v9 = vshrl.u32 %v92_v3, %v108_v6  ;;  %v113_v10 = vadd.s32 127, %v112_v8 }
  0x44   :  { %v111_v11 = vor.u32 %v110_v9, %v109_v7  ;;  %v114_v12 = vshll.u32 %v113_v10, 23 }
  0x46   :  { %v115_v13 = vor.u32 4788187, %v114_v12  ;;  %v118_v14 = vcvt.s32.f32 %v111_v11 }
  0x48   :  { %v116_v15 = vand.u32 2147483647, %v115_v13 }
  0x4a   :  { %v119_v16 = vmul.f32 %v118_v14, %v116_v15 }
  0x4c   :  { %v120_v18 = vxor.u32 2147483648, %v119_v16 }
  0x4e   :  { %v121_v19 = vsel %vm38_vm7, %v120_v18, %v119_v16 }
  0x4f   :  { %v124_v21 = vsel %vm37_vm8, %v270_v2, %v121_v19 }
  0x50   :  { %185 = vcosq.f32 %v124_v21 }
  0x51   :  { %187 = vsinq.f32 %v124_v21 }
  0x5d   :  { %v186_v25 = vpop.eup %185 }
  0x5e   :  { %v188_v26 = vpop.eup %187  ;;  %v136_v27 = vxor.u32 2147483648, %v186_v25 }
  0x5f   :  { %v133_v28 = vxor.u32 2147483648, %v188_v26 }
  0x60   :  { %v137_v5 = vsel %vm135_vm9, %v136_v27, %v188_v26 }
  0x61   :  { %v134_v29 = vsel %vm132_vm10, %v186_v25, %v133_v28 }
  0x62   :  { %v138_v30 = vsel %vm131_vm11, %v134_v29, %v137_v5 }
  0x63   :  { %v139_v31 = vsel %vm128_vm12, nan, %v138_v30 }
  0x64   :  { %v141_v33 = vmul.f32 %v139_v31, %v139_v31 }
  0x66   :  { %v148_v34 = vmul.f32 %v172_v32, %v141_v33 }
  0x68   :  { %v149_v35 = vadd.f32 %v148_v34, %v264_v0 }
  0x6a   :  { %151 = vst.msk [vmem:[#allocation5] sm:$0x3] %vm150_vm13, %v149_v35 }
  0x6b   :  { %220 = shalt.err (!%p217_p9)
}
  0x6c   :  { %161 = dma.vmem_to_hbm [thread:$0]  %s159_s20, 32, %s301_s3, [#allocation4]  }
  0x6d   :  { %231 = dma.done.wait [#allocation4], 32  }
  0x6e   :  { %232 = vsyncadd [#allocation4], 4294967264 }
  0x6f   :  { %165 = vsyncpa [#allocation3], 1 }
  0x70   :  { %166 = vsyncpa [#allocation4], 1 }

</bundles_post_ra>
